<compile_context>
chip_gen: v5e
topology: v5e:2x2
jax: 0.10.0
libtpu: 0.0.40
codegen_flags: <defaults>
</compile_context>

<pallas_src>
import functools

import jax
import jax.numpy as jnp
from jax.experimental import pallas as pl
from jax.experimental.pallas import tpu as pltpu

LANE = 128
SUBLANE = 8


def _bce_kernel(x_ref, t_ref, o_ref, *, thresh):
    j = pl.program_id(1)

    @pl.when(j == 0)
    def _():
        o_ref[...] = jnp.zeros_like(o_ref)

    x = x_ref[...].astype(jnp.float32)
    # targets = (targets >= thresh) * 1, cast to float
    t = (t_ref[...].astype(jnp.float32) >= thresh).astype(jnp.float32)

    # Numerically stable BCE with logits (matches nn.BCEWithLogitsLoss):
    #   loss = max(x, 0) - x*t + log(1 + exp(-|x|))
    loss = jnp.maximum(x, 0.0) - x * t + jnp.log1p(jnp.exp(-jnp.abs(x)))

    # Lane-shaped accumulation: (tm, 128) -> (1, tm//8, 8, 128) -> sum over tiles
    # of 8 sublanes (VPU adds only; no per-step cross-lane reduction).
    o_ref[...] += loss.reshape(1, -1, SUBLANE, LANE).sum(axis=1)


def bce_with_logits_loss(inputs, targets, thresh=0.5, tm=2048, num_splits=2):
    """Mean BCE-with-logits over all elements; targets binarized at `thresh`."""
    n = int(inputs.size)
    rows = pl.cdiv(n, LANE)

    # Clamp the row tile for small inputs; keep it a multiple of 8 sublanes.
    tm = max(SUBLANE, min(int(tm), pl.cdiv(rows, num_splits)))
    tm = pl.cdiv(tm, SUBLANE) * SUBLANE
    steps = pl.cdiv(rows, num_splits * tm)
    rows_padded = num_splits * steps * tm
    padded_n = rows_padded * LANE
    pad = padded_n - n

    def _prep(a, pad_val):
        flat = a.reshape(-1)  # native dtype; cast happens inside the kernel
        if pad:
            flat = jnp.concatenate(
                [flat, jnp.full((pad,), pad_val, dtype=flat.dtype)])
        return flat.reshape(rows_padded, LANE)

    # Padding choice makes padded elements contribute ~0 loss (< 4e-44 each),
    # so no validity mask is needed in the kernel.
    x2d = _prep(inputs, -100.0)   # max(x,0)=0, x*t=0, log1p(exp(-100)) ~= 0
    t2d = _prep(targets, 0.0)     # binarizes to 0

    cost = pl.CostEstimate(
        flops=8 * n,
        transcendentals=2 * n,
        bytes_accessed=(n * inputs.dtype.itemsize
                        + n * targets.dtype.itemsize
                        + num_splits * SUBLANE * LANE * 4),
    )

    kernel = functools.partial(_bce_kernel, thresh=float(thresh))

    out = pl.pallas_call(
        kernel,
        out_shape=jax.ShapeDtypeStruct((num_splits, SUBLANE, LANE), jnp.float32),
        grid_spec=pltpu.PrefetchScalarGridSpec(
            num_scalar_prefetch=0,
            grid=(num_splits, steps),
            in_specs=[
                pl.BlockSpec((tm, LANE), lambda i, j: (i * steps + j, 0)),
                pl.BlockSpec((tm, LANE), lambda i, j: (i * steps + j, 0)),
            ],
            out_specs=pl.BlockSpec((1, SUBLANE, LANE), lambda i, j: (i, 0, 0)),
        ),
        compiler_params=pltpu.CompilerParams(
            dimension_semantics=("parallel", "arbitrary")),
        cost_estimate=cost,
    )(x2d, t2d)

    # Single cross-lane reduction of the per-split partial sums, then the mean.
    return jnp.sum(out) / jnp.float32(n)


def _reference(inputs, targets, thresh=0.5):
    x = inputs.astype(jnp.float32)
    t = (targets.astype(jnp.float32) >= thresh).astype(jnp.float32)
    loss = jnp.maximum(x, 0.0) - x * t + jnp.log1p(jnp.exp(-jnp.abs(x)))
    return jnp.mean(loss)


if __name__ == "__main__":
    key = jax.random.PRNGKey(0)
    k1, k2 = jax.random.split(key)
    # NCHW logits and soft targets in [0, 1]
    B, C, H, W = 2, 4, 16, 16
    inputs = jax.random.normal(k1, (B, C, H, W), dtype=jnp.float32)
    targets = jax.random.uniform(k2, (B, C, H, W), dtype=jnp.float32)

    loss = bce_with_logits_loss(inputs, targets, thresh=0.5)
    loss = jax.block_until_ready(loss)

    ref = _reference(inputs, targets, thresh=0.5)
    assert jnp.allclose(loss, ref, atol=1e-5, rtol=1e-5), (loss, ref)
    print("KERNEL_OK")
</pallas_src>

<mosaic_0001>
module attributes {stable_mosaic.version = 11 : i64} {
  func.func @_bce_kernel(%arg0: i32, %arg1: i32, %arg2: memref<8x128xf32, #tpu.memory_space<vmem>>, %arg3: memref<8x128xf32, #tpu.memory_space<vmem>>, %arg4: memref<1x8x128xf32, #tpu.memory_space<vmem>>) attributes {dimension_semantics = [#tpu.dimension_semantics<parallel>, #tpu.dimension_semantics<arbitrary>], iteration_bounds = array<i64: 2, 1>, scalar_prefetch = 0 : i64, scratch_operands = 0 : i64, tpu.core_type = #tpu.core_type<tc>, window_params = [{transform_indices = @transform_0, window_bounds = array<i64: 8, 128>}, {transform_indices = @transform_1, window_bounds = array<i64: 8, 128>}, {transform_indices = @transform_2, window_bounds = array<i64: 1, 8, 128>}]} {
    %c0_i32 = arith.constant 0 : i32
    %0 = arith.cmpi eq, %arg1, %c0_i32 : i32
    %1 = arith.extui %0 : i1 to i32
    %c0_i32_0 = arith.constant 0 : i32
    %2 = arith.cmpi ne, %1, %c0_i32_0 : i32
    scf.if %2 {
      %cst_13 = arith.constant 0.000000e+00 : f32
      %24 = vector.broadcast %cst_13 : f32 to vector<1x8x128xf32>
      %c0_14 = arith.constant 0 : index
      %c0_15 = arith.constant 0 : index
      %c0_16 = arith.constant 0 : index
      %25 = vector.load %arg4[%c0_14, %c0_15, %c0_16] : memref<1x8x128xf32, #tpu.memory_space<vmem>>, vector<1x8x128xf32>
      tpu.vector_store %arg4[%c0_14, %c0_15, %c0_16], %24 {strides = array<i32>} : memref<1x8x128xf32, #tpu.memory_space<vmem>>, vector<1x8x128xf32>,
    } else {
    }
    %c0 = arith.constant 0 : index
    %c0_1 = arith.constant 0 : index
    %3 = vector.load %arg2[%c0, %c0_1] : memref<8x128xf32, #tpu.memory_space<vmem>>, vector<8x128xf32>
    %c0_2 = arith.constant 0 : index
    %c0_3 = arith.constant 0 : index
    %4 = vector.load %arg3[%c0_2, %c0_3] : memref<8x128xf32, #tpu.memory_space<vmem>>, vector<8x128xf32>
    %cst = arith.constant 5.000000e-01 : f32
    %5 = vector.broadcast %cst : f32 to vector<8x128xf32>
    %6 = arith.cmpf oge, %4, %5 : vector<8x128xf32>
    %7 = arith.extui %6 : vector<8x128xi1> to vector<8x128xi32>
    %8 = arith.sitofp %7 : vector<8x128xi32> to vector<8x128xf32>
    %cst_4 = arith.constant 0.000000e+00 : f32
    %9 = vector.broadcast %cst_4 : f32 to vector<8x128xf32>
    %10 = arith.maximumf %3, %9 : vector<8x128xf32>
    %11 = arith.mulf %3, %8 : vector<8x128xf32>
    %12 = arith.subf %10, %11 : vector<8x128xf32>
    %13 = math.absf %3 : vector<8x128xf32>
    %cst_5 = arith.constant 0.000000e+00 : f32
    %14 = vector.broadcast %cst_5 : f32 to vector<8x128xf32>
    %15 = arith.subf %14, %13 : vector<8x128xf32>
    %16 = math.exp %15 : vector<8x128xf32>
    %17 = math.log1p %16 : vector<8x128xf32>
    %18 = arith.addf %12, %17 : vector<8x128xf32>
    %c0_6 = arith.constant 0 : index
    %c0_7 = arith.constant 0 : index
    %c0_8 = arith.constant 0 : index
    %19 = vector.load %arg4[%c0_6, %c0_7, %c0_8] : memref<1x8x128xf32, #tpu.memory_space<vmem>>, vector<1x8x128xf32>
    %20 = vector.shape_cast %18 : vector<8x128xf32> to vector<1x1x8x128xf32>
    %cst_9 = arith.constant dense<0.000000e+00> : vector<1x8x128xf32>
    %21 = vector.multi_reduction <add>, %20, %cst_9 [1] : vector<1x1x8x128xf32> to vector<1x8x128xf32>
    %22 = arith.addf %19, %21 : vector<1x8x128xf32>
    %c0_10 = arith.constant 0 : index
    %c0_11 = arith.constant 0 : index
    %c0_12 = arith.constant 0 : index
    %23 = vector.load %arg4[%c0_10, %c0_11, %c0_12] : memref<1x8x128xf32, #tpu.memory_space<vmem>>, vector<1x8x128xf32>
    tpu.vector_store %arg4[%c0_10, %c0_11, %c0_12], %22 {strides = array<i32>} : memref<1x8x128xf32, #tpu.memory_space<vmem>>, vector<1x8x128xf32>,
    return
  }
  func.func @transform_0(%arg0: i32, %arg1: i32) -> (i32, i32) {
    %c1_i32 = arith.constant 1 : i32
    %0 = arith.muli %arg0, %c1_i32 : i32
    %1 = arith.addi %0, %arg1 : i32
    %c0_i32 = arith.constant 0 : i32
    %c0_i32_0 = arith.constant 0 : i32
    return %1, %c0_i32 : i32, i32
  }
  func.func @transform_1(%arg0: i32, %arg1: i32) -> (i32, i32) {
    %c1_i32 = arith.constant 1 : i32
    %0 = arith.muli %arg0, %c1_i32 : i32
    %1 = arith.addi %0, %arg1 : i32
    %c0_i32 = arith.constant 0 : i32
    %c0_i32_0 = arith.constant 0 : i32
    return %1, %c0_i32 : i32, i32
  }
  func.func @transform_2(%arg0: i32, %arg1: i32) -> (i32, i32, i32) {
    %c0_i32 = arith.constant 0 : i32
    %c0_i32_0 = arith.constant 0 : i32
    %c0_i32_1 = arith.constant 0 : i32
    return %arg0, %c0_i32, %c0_i32_0 : i32, i32, i32
  }
}

</mosaic_0001>

<bundles_post_ra>
// kernel: tpu_custom_call.1
= control target key start
LH: loop header
LB: loop body
LE: loop exit
PB: predicated region body
PF: predicated region fallthrough
CT: control target
= control target key end

     0   :  { %7 = vsyncpa [#allocation3], 0  ;;  %s756_s0 = inlined_call_operand.hbm [shape: f32[16,128], index: 0, kind: input, shape index: {}]   ;;  %s757_s1 = inlined_call_operand.hbm [shape: f32[16,128], index: 1, kind: input, shape index: {}]   ;;  %s758_s2 = inlined_call_operand.hbm [shape: f32[2,8,128], index: 2, kind: output, shape index: {}]  }
   0x1   :  { %9 = vsyncpa [#allocation3 + $0x1], 0 }
   0x2   :  { %10 = vsyncpa [#allocation6], 0 }
   0x3   :  { %12 = vsyncpa [#allocation6 + $0x1], 0 }
   0x4   :  { %13 = vsyncpa [#allocation4], 0 }
   0x5   :  { %15 = vsyncpa [#allocation4 + $0x1], 0  ;;  %s623_s9 = smov 0   ;;  %s625_s10 = smov 0  }
   0x6   :  { %s627_s11 = smov 0   ;;  %s629_s12 = smov 0  }
   0x7   :  { %s631_s13 = smov 0   ;;  %s633_s14 = smov 0  }
   0x8 LB: > { %s370_s15 = sadd.s32 4294967295, %s605_s14   ;;  %s371_s16 = sadd.s32 4294967294, %s605_s14   ;;  %s605_s14 = sphi %s633_s14, %s21_s14   ;;  %s601_s13 = sphi %s631_s13, %s767_s13   ;;  %s597_s12 = sphi %s629_s12, %s766_s12   ;;  %s593_s11 = sphi %s627_s11, %s765_s11   ;;  %s589_s10 = sphi %s625_s10, %s764_s10   ;;  %s585_s9 = sphi %s623_s9, %s763_s9  }
   0x9   : > { %s33_s17 = sadd.s32 1, %s601_s13  ;;  %s42_s18 = sadd.s32 1, %s593_s11 }
   0xa   : > { %p35_p0 = scmp.ge.s32.totalorder %s33_s17, 2  ;;  %p49_p1 = scmp.ne.s32.totalorder %s593_s11, %s589_s10 }
   0xb   : > { %p50_p2 = scmp.eq.s32.totalorder %s605_s14, 0  ;;  %p55_p3 = scmp.ne.s32.totalorder %s589_s10, %s585_s9 }
   0xc   : > { %s769_s17 = smov (%p35_p0, %s33_s17), 0  ;;  %p56_p5 = scmp.eq.s32.totalorder %s370_s15, 0 }
   0xd   : > { %p664_p4 = por %p50_p2, %p49_p1  ;;  %s39_s20 = ssub.s32 %s601_s13, %s769_s17 }
   0xe   : > { %p107_p6 = scmp.eq.s32.totalorder %s370_s15, 1  ;;  %p40_p7 = scmp.eq.s32.totalorder %s39_s20, 0 }
   0xf   : > { %p670_p8 = por %p56_p5, %p55_p3  ;;  %p113_p10 = scmp.eq.s32.totalorder %s371_s16, 1 }
  0x10   : > { %p674_p9 = por %p107_p6, %p49_p1  ;;  %p373_p12 = scmp.ge.s32.totalorder %s605_s14, 2 }
  0x11   : > { %s679_s23 = scalar_select %p40_p7, %s593_s11, %s42_s18  }
  0x12   : > { %p681_p11 = por %p113_p10, %p55_p3  ;;  %p404_p13 = scmp.lt.s32.totalorder %s605_s14, 2 }
  0x13   : > { %s133_s25 = sand.u32 1, %s593_s11   ;;  %s375_s27 = sshll.u32 %s601_s13, 3 }
  0x14   : > { %s374_s26 = sshll.u32 %s133_s25, 3  ;;  %s142_s30 = scalar_lea.hbm %s756_s0, %s375_s27 }
  0x15   : > { %s137_s3 = scalar_lea.vmem [#allocation2], %s374_s26  ;;  %s144_s5 = sshll.u32 %s142_s30, 4  ;;  %s145_s5 = int_to_ptr.hbm [resolvable:$true] %s144_s5 }
  0x16   : > { %s146_s4 = sshll.u32 %s137_s3, 4  ;;  %p394_p0 = pnand %p404_p13, %p664_p4  ;;  %s147_s4 = int_to_ptr.vmem [resolvable:$true] %s146_s4 }
  0x17   : > { %p378_p1 = scmp.ge.s32.totalorder %s605_s14, 1  ;;  %p171_p2 = scmp.lt.s32.totalorder %s605_s14, 3 }
  0x18   : > { %s134_s6 = scalar_lea.sflag [#allocation3], %s133_s25  ;;  %s162_s15 = scalar_lea.hbm %s757_s1, %s375_s27 }
  0x19   : > { %396 = dma.hbm_to_vmem [thread:$0]  (!%p394_p0), %s145_s5, 128, %s147_s4, %s134_s6  }
  0x1a   : > { %p172_p3 = pnand %p378_p1, %p171_p2  ;;  %s157_s16 = scalar_lea.vmem [#allocation5], %s374_s26 }
  0x1b   : > { %s166_s18 = sshll.u32 %s157_s16, 4  ;;  %s164_s20 = sshll.u32 %s162_s15, 4  ;;  %s167_s18 = int_to_ptr.vmem [resolvable:$true] %s166_s18  ;;  %s165_s20 = int_to_ptr.hbm [resolvable:$true] %s164_s20 }
  0x1c   : > { %s154_s28 = scalar_lea.sflag [#allocation6], %s133_s25  ;;  %175 = sbr.rel (%p172_p3) target bundleno = 67 (0x43), region = 28 }
  0x1d   : > { %399 = dma.hbm_to_vmem [thread:$0]  (!%p394_p0), %s165_s20, 128, %s167_s18, %s154_s28  }
  0x1e   : > { %s700_s19 = sand.u32 (!%p172_p3), 1, %s589_s10  }
  0x1f   : > { %s703_s29 = sshll.u32 (!%p172_p3), %s700_s19, 3  ;;  %s178_s30 = scalar_lea.sflag (!%p172_p3), [#allocation3], %s700_s19 }
  0x20   : > { %s181_s3 = scalar_lea.vmem (!%p172_p3), [#allocation2], %s703_s29 }
  0x21   : > { %572 = dma.done.wait (%p670_p8), %s178_s30, 128  }
  0x22   : > { %574 = vsyncadd (%p670_p8), %s178_s30, 4294967168  ;;  %s188_s25 = scalar_lea.sflag [#allocation6], %s700_s19  ;;  %s191_s26 = scalar_lea.vmem [#allocation5], %s703_s29 }
  0x23   : > { %576 = dma.done.wait (%p670_p8), %s188_s25, 128  }
  0x24   : > { %578 = vsyncadd (%p670_p8), %s188_s25, 4294967168  ;;  %v225_v0 = vld [vmem:[%s181_s3] sm:$0xff]  ;;  %v226_v4 = vld [vmem:[%s191_s26] sm:$0xff]  ;;  %v607_v8 = vmov 0.0   ;;  %s384_s21 = sshll.u32 %s597_s12, 3  ;;  %s217_s6 = scalar_lea.vmem [#allocation7], %s703_s29 }
  0x25   : > { %v233_v1 = vand.u32 2147483647, %v225_v0  ;;  %vm227_vm0 = vcmp.ge.f32.partialorder %v226_v4, 0.5  ;;  %v230_v11 = vmax.f32 %v225_v0, 0.0  ;;  %s262_s5 = scalar_lea.hbm %s758_s2, %s384_s21  ;;  %s264_s7 = sshll.u32 %s217_s6, 4  ;;  %s265_s7 = int_to_ptr.vmem [resolvable:$true] %s264_s7 }
  0x26   : > { %v382_v9 = vsel %vm227_vm0, 1.0, %v607_v8  ;;  %s266_s8 = sshll.u32 %s262_s5, 4  ;;  %s252_s15 = scalar_lea.sflag [#allocation4], %s700_s19  ;;  %s267_s8 = int_to_ptr.hbm [resolvable:$true] %s266_s8 }
  0x27   : > { %v234_v2 = vsub.f32 0.0, %v233_v1  ;;  %v231_v12 = vmul.f32 %v382_v9, %v225_v0  ;;  %s533_s12 = sshra.s32 %s267_s8, 4  ;;  %s539_s28 = scalar_lea.hbm %s758_s2, 16  ;;  %s534_s12 = int_to_ptr.hbm [resolvable:$true] %s533_s12 }
  0x28   : > { %s535_s16 = scalar_lea.hbm %s534_s12, 8  ;;  %p540_p7 = scmp.lt.s32.totalorder %s534_s12, %s758_s2 }
  0x29   : > { %v235_v3 = vmul.f32 1.442695, %v234_v2  ;;  %v232_v16 = vsub.f32 %v230_v11, %v231_v12  ;;  %p536_p4 = scmp.ne.s32.totalorder %s534_s12, %s535_s16  ;;  %p541_p8 = scmp.lt.s32.totalorder %s539_s28, %s535_s16 }
  0x2b   : > { %455 = vpow2.f32 %v235_v3  ;;  %p537_p5 = pnand %p536_p4, %p674_p9  ;;  %p542_p10 = por %p541_p8, %p540_p7 }
  0x2d   : > { %p538_p6 = pneg %p537_p5 }
  0x2f   : > { %p543_p13 = pnand %p542_p10, %p538_p6 }
  0x31   : > { %v456_v5 = vpop.eup %455 }
  0x32   : > { %v237_v6 = vadd.f32 1.0, %v456_v5  ;;  %v240_v7 = vmul.f32 -0.5, %v456_v5  ;;  %v243_v13 = vand.u32 2147483647, %v456_v5 }
  0x34   : > { %457 = vlog2.f32 %v237_v6  ;;  %v241_v10 = vadd.f32 1.0, %v240_v7  ;;  %vm244_vm1 = vcmp.lt.f32.partialorder %v243_v13, 0.0004427343 }
  0x36   : > { %v242_v14 = vmul.f32 %v456_v5, %v241_v10 }
  0x3a   : > { %v458_v15 = vpop.eup %457 }
  0x3b   : > { %v239_v17 = vmul.f32 0.6931472, %v458_v15 }
  0x3d   : > { %v245_v18 = vsel %vm244_vm1, %v242_v14, %v239_v17 }
  0x3e   : > { %v246_v19 = vadd.f32 %v245_v18, %v232_v16 }
  0x40   : > { %250 = vst [vmem:[%s217_s6] sm:$0xff] %v246_v19 }
  0x41   : > { %546 = shalt.err (!%p543_p13)
}
  0x42   : > { %391 = dma.vmem_to_hbm [thread:$0]  (%p674_p9), %s265_s7, 128, %s267_s8, %s252_s15  }
  0x43 PF: > { %s278_s19 = sand.u32 1, %s585_s9   ;;  %p401_p0 = pnand %p373_p12, %p681_p11 }
  0x44   : > { %s279_s3 = scalar_lea.sflag [#allocation4], %s278_s19 }
  0x45   : > { %p402_p1 = pneg %p401_p0 }
  0x47   : > { %580 = dma.done.wait (%p402_p1), %s279_s3, 128  }
  0x48   : > { %582 = vsyncadd (%p402_p1), %s279_s3, 4294967168  ;;  %s21_s14 = sadd.s32 1, %s605_s14   ;;  %s763_s9 = smov %s589_s10 }
  0x49   : > { %p18_p2 = scmp.ge.s32.totalorder %s21_s14, 4   ;;  %s764_s10 = smov %s593_s11 }
  0x4a   : > { %s765_s11 = smov %s679_s23  ;;  %s766_s12 = smov %s601_s13 }
  0x4b   : > { %s767_s13 = smov %s769_s17  ;;  %20 = sbr.rel (!%p18_p2) target bundleno = 8 (0x8), region = 90 }
  0x50   :  { %285 = vsyncpa [#allocation3], 1 }
  0x51   :  { %287 = vsyncpa [#allocation3 + $0x1], 1 }
  0x52   :  { %288 = vsyncpa [#allocation6], 1 }
  0x53   :  { %290 = vsyncpa [#allocation6 + $0x1], 1 }
  0x54   :  { %291 = vsyncpa [#allocation4], 1 }
  0x55   :  { %293 = vsyncpa [#allocation4 + $0x1], 1 }

</bundles_post_ra>
